<compile_context>
chip_gen: v6e
topology: v6e:2x2x1
jax: 0.10.0
libtpu: 0.0.40
codegen_flags: <defaults>
</compile_context>

<pallas_src>
import functools
import math

import jax
import jax.numpy as jnp
from jax.experimental import pallas as pl
from jax.experimental.pallas import tpu as pltpu

_LANE = 128
_SUB = 16          # sublane padding of the batch (covers f32 and bf16 packing)
_TB_MAX = 1024     # max batch-tile rows (multiple of 256)


def _round_up(x, m):
    return ((x + m - 1) // m) * m


def _vmem_capacity_bytes():
    """Physical per-core VMEM; conservative 64 MiB (v7x) fallback."""
    try:
        cap = getattr(pltpu.get_tpu_info(), "vmem_capacity_bytes", None)
        if cap:
            return int(cap)
    except Exception:
        pass
    return 64 * 1024 * 1024


def _qactor_kernel(activation, negative_slope, num_layers,
                   state_ref, ap_ref, *refs):
    """refs = (w0_s, w0_p, b0, w1, b1, ..., w_{L-1}, b_{L-1}, out_ref)."""
    out_ref = refs[-1]
    wb = refs[:-1]
    assert len(wb) == 3 + 2 * (num_layers - 1)

    def _dot(a, w_ref):
        w = w_ref[...]
        return jnp.dot(a.astype(w.dtype), w, preferred_element_type=jnp.float32)

    def _act(v):
        if activation == "relu":
            return jnp.maximum(v, 0.0)
        elif activation == "leaky_relu":
            return jnp.where(v >= 0.0, v, negative_slope * v)
        raise ValueError("Unknown activation function " + str(activation))

    # Layer 0: fused concat -> two matmuls on the state / action-parameter halves.
    x = _dot(state_ref[...], wb[0]) + _dot(ap_ref[...], wb[1]) + wb[2][...]
    if num_layers > 1:
        x = _act(x)
    for i in range(1, num_layers):
        w_ref = wb[3 + 2 * (i - 1)]
        b_ref = wb[4 + 2 * (i - 1)]
        x = _dot(x, w_ref) + b_ref[...]
        if i < num_layers - 1:
            x = _act(x)
    out_ref[...] = x.astype(out_ref.dtype)


def _qactor_forward(activation, negative_slope, num_layers, action_size,
                    vmem_cap, state, action_parameters, *params):
    compute_dtype = params[0].dtype                 # weight dtype (f32 or bf16)
    state = state.astype(compute_dtype)
    action_parameters = action_parameters.astype(compute_dtype)

    batch, s_dim = state.shape
    p_dim = action_parameters.shape[1]
    in_itemsize = jnp.dtype(compute_dtype).itemsize

    # ---- batch tiling -------------------------------------------------------
    # Pad the batch so every tile is fully sublane-aligned (no ragged tail),
    # then pick the largest tile that fits the tile budget.  For mid-size
    # batches force exactly 2 grid steps so the "parallel" batch axis can be
    # sharded across both TensorCores on v7x.
    b_pad = _round_up(batch, _SUB)
    in_row = (s_dim + p_dim) * in_itemsize
    out_row = action_size * 4
    tile_budget = 8 * 1024 * 1024                   # for double-buffered tiles
    tb_cap = max(_SUB, (tile_budget // (2 * (in_row + out_row))) // _SUB * _SUB)
    tb_max = min(_TB_MAX, tb_cap)
    if b_pad <= 256:
        tb = b_pad
    elif b_pad <= 2 * tb_max:
        tb = _round_up((b_pad + 1) // 2, _SUB)      # exactly two tiles
        b_pad = 2 * tb
    else:
        tb = tb_max
        b_pad = _round_up(b_pad, tb)
    grid = (b_pad // tb,)

    if b_pad != batch:
        pad = b_pad - batch
        state = jnp.pad(state, ((0, pad), (0, 0)))
        action_parameters = jnp.pad(action_parameters, ((0, pad), (0, 0)))

    kernel = functools.partial(_qactor_kernel, activation, negative_slope,
                               num_layers)

    act_specs = [
        pl.BlockSpec((tb, s_dim), lambda i: (i, 0)),
        pl.BlockSpec((tb, p_dim), lambda i: (i, 0)),
    ]
    # Weights / biases: constant index_map -> copied once, VMEM-resident across
    # all batch tiles.
    # TODO(synk): mark these pipeline_mode=pl.Buffered(1) (single buffer) once
    # verified on the target jax version; would halve resident param VMEM.
    param_specs = [pl.BlockSpec(p.shape, lambda i: (0, 0)) for p in params]
    out_spec = pl.BlockSpec((tb, action_size), lambda i: (i, 0))

    # Cost estimate: helps XLA schedule this small custom call tightly.
    h0 = params[0].shape[1]
    flops = 2 * b_pad * (s_dim + p_dim) * h0
    widths = [h0]
    for i in range(1, num_layers):
        w = params[3 + 2 * (i - 1)]
        flops += 2 * b_pad * w.shape[0] * w.shape[1]
        widths.append(w.shape[1])
    param_bytes = sum(int(p.size) * p.dtype.itemsize for p in params)
    io_bytes = in_itemsize * b_pad * (s_dim + p_dim) + 4 * b_pad * action_size
    cost = pl.CostEstimate(flops=int(flops), transcendentals=0,
                           bytes_accessed=int(param_bytes + io_bytes))

    # Generation-aware VMEM budget: resident params (double-buffered by the
    # pipeline), double-buffered activation tiles, f32 intermediates, headroom;
    # capped at ~80% of physical VMEM (queried, not a flat 64 MiB clamp).
    act_tile_bytes = tb * (in_row + out_row)
    interm_bytes = 4 * tb * max(widths)
    need = (2 * param_bytes + 4 * act_tile_bytes + 2 * interm_bytes
            + (4 * 1024 * 1024))
    vmem_limit = int(min(int(0.8 * vmem_cap), max(16 * 1024 * 1024, need)))

    out = pl.pallas_call(
        kernel,
        out_shape=jax.ShapeDtypeStruct((b_pad, action_size), jnp.float32),
        grid=grid,
        in_specs=act_specs + param_specs,
        out_specs=out_spec,
        compiler_params=pltpu.CompilerParams(
            dimension_semantics=("parallel",),
            vmem_limit_bytes=vmem_limit),
        cost_estimate=cost,
    )(state, action_parameters, *params)

    return out[:batch] if b_pad != batch else out


class QActorPallas:
    """JAX/Pallas re-implementation of PDQN QActor's forward pass."""

    def __init__(self, state_size, action_size, action_parameter_size,
                 hidden_layers=(100,), output_layer_init_std=None,
                 activation="relu", param_dtype=jnp.bfloat16, seed=0):
        self.state_size = state_size
        self.action_size = action_size
        self.action_parameter_size = action_parameter_size
        self.activation = activation

        key = jax.random.PRNGKey(seed)
        sizes = [state_size + action_parameter_size]
        if hidden_layers is not None:
            sizes += list(hidden_layers)
        sizes += [action_size]
        n_linear = len(sizes) - 1

        # Raw (unpadded) params, kept for reference checks: W stored as [in, out].
        self._raw_weights = []
        self._raw_biases = []
        for i in range(n_linear):
            fan_in, fan_out = sizes[i], sizes[i + 1]
            key, wk = jax.random.split(key)
            if i < n_linear - 1:
                # kaiming_normal_(nonlinearity=activation), fan_in mode, a=0.
                gain = math.sqrt(2.0)
                std = gain / math.sqrt(fan_in)
                w = std * jax.random.normal(wk, (fan_in, fan_out), dtype=jnp.float32)
            else:
                if output_layer_init_std is not None:
                    w = output_layer_init_std * jax.random.normal(
                        wk, (fan_in, fan_out), dtype=jnp.float32)
                else:
                    # PyTorch nn.Linear default: uniform(-1/sqrt(fan_in), 1/sqrt(fan_in))
                    bound = 1.0 / math.sqrt(fan_in)
                    w = jax.random.uniform(wk, (fan_in, fan_out), dtype=jnp.float32,
                                           minval=-bound, maxval=bound)
            b = jnp.zeros((1, fan_out), dtype=jnp.float32)   # all biases zero-init
            self._raw_weights.append(w)
            self._raw_biases.append(b)

        # Hidden feature dims padded to lane multiples (128); the final output
        # dim stays exactly action_size (lane-dense padding there would inflate
        # the output HBM stream ~32x for small action spaces).
        out_pads = [_round_up(s, _LANE) for s in sizes[1:-1]] + [action_size]

        def _pad_w(w, in_pad, out_pad):
            wp = jnp.zeros((in_pad, out_pad), dtype=jnp.float32)
            wp = wp.at[:w.shape[0], :w.shape[1]].set(w)
            return wp.astype(param_dtype)

        def _pad_b(b, out_pad):
            bp = jnp.zeros((1, out_pad), dtype=jnp.float32)   # bias stays f32
            return bp.at[:, :b.shape[1]].set(b)

        params = []
        # Layer 0: split along the input axis into state / action-parameter
        # halves so the concat is fused into the kernel.
        w0 = self._raw_weights[0]
        params.append(_pad_w(w0[:state_size, :], state_size, out_pads[0]))
        params.append(_pad_w(w0[state_size:, :], action_parameter_size, out_pads[0]))
        params.append(_pad_b(self._raw_biases[0], out_pads[0]))
        for i in range(1, n_linear):
            params.append(_pad_w(self._raw_weights[i], out_pads[i - 1], out_pads[i]))
            params.append(_pad_b(self._raw_biases[i], out_pads[i]))
        self._params = tuple(params)

        self._forward = jax.jit(functools.partial(
            _qactor_forward, activation, 0.01, n_linear, action_size,
            _vmem_capacity_bytes()))

    def __call__(self, state, action_parameters):
        return self._forward(state, action_parameters, *self._params)


if __name__ == "__main__":
    # Small, module-consistent shapes: batch=2, state=16, action_params=8,
    # hidden_layers=(100,), action_size=4.
    batch = 2
    state_size = 16
    action_parameter_size = 8
    action_size = 4

    key = jax.random.PRNGKey(0)
    ks, ka = jax.random.split(key)
    state = jax.random.normal(ks, (batch, state_size), dtype=jnp.float32)
    action_params = jax.random.normal(ka, (batch, action_parameter_size),
                                      dtype=jnp.float32)

    def ref_forward(actor, s, ap):
        x = jnp.concatenate([s, ap], axis=1)
        n = len(actor._raw_weights)
        for i in range(n):
            x = x @ actor._raw_weights[i] + actor._raw_biases[i]
            if i < n - 1:
                x = jnp.maximum(x, 0.0)
        return x

    # f32 parameter path: tight check against the pure-JAX reference.
    actor_f32 = QActorPallas(state_size, action_size, action_parameter_size,
                             hidden_layers=(100,), activation="relu",
                             param_dtype=jnp.float32, seed=0)
    q32 = jax.block_until_ready(actor_f32(state, action_params))
    q32_ref = ref_forward(actor_f32, state, action_params)
    assert q32.shape == (batch, action_size)
    assert jnp.allclose(q32, q32_ref, atol=1e-4, rtol=1e-4)

    # Default path (bf16 weights/activations, f32 accumulation): loose check.
    actor_bf16 = QActorPallas(state_size, action_size, action_parameter_size,
                              hidden_layers=(100,), activation="relu", seed=0)
    qbf = jax.block_until_ready(actor_bf16(state, action_params))
    qbf_ref = ref_forward(actor_bf16, state, action_params)
    assert qbf.shape == (batch, action_size)
    assert jnp.allclose(qbf, qbf_ref, atol=5e-2, rtol=5e-2)

    print("KERNEL_OK")
</pallas_src>

<mosaic_0001>
module attributes {stable_mosaic.version = 11 : i64} {
  func.func @_qactor_kernel(%arg0: i32, %arg1: memref<16x16xf32, #tpu.memory_space<vmem>>, %arg2: memref<16x8xf32, #tpu.memory_space<vmem>>, %arg3: memref<16x128xf32, #tpu.memory_space<vmem>>, %arg4: memref<8x128xf32, #tpu.memory_space<vmem>>, %arg5: memref<1x128xf32, #tpu.memory_space<vmem>>, %arg6: memref<128x4xf32, #tpu.memory_space<vmem>>, %arg7: memref<1x4xf32, #tpu.memory_space<vmem>>, %arg8: memref<16x4xf32, #tpu.memory_space<vmem>>) attributes {dimension_semantics = [#tpu.dimension_semantics<parallel>], iteration_bounds = array<i64: 1>, scalar_prefetch = 0 : i64, scratch_operands = 0 : i64, tpu.core_type = #tpu.core_type<tc>, window_params = [{transform_indices = @transform_0, window_bounds = array<i64: 16, 16>}, {transform_indices = @transform_1, window_bounds = array<i64: 16, 8>}, {pipeline_mode = #tpu.pipeline_mode<synchronous>, transform_indices = @transform_2, window_bounds = array<i64: 16, 128>}, {pipeline_mode = #tpu.pipeline_mode<synchronous>, transform_indices = @transform_3, window_bounds = array<i64: 8, 128>}, {pipeline_mode = #tpu.pipeline_mode<synchronous>, transform_indices = @transform_4, window_bounds = array<i64: 1, 128>}, {pipeline_mode = #tpu.pipeline_mode<synchronous>, transform_indices = @transform_5, window_bounds = array<i64: 128, 4>}, {pipeline_mode = #tpu.pipeline_mode<synchronous>, transform_indices = @transform_6, window_bounds = array<i64: 1, 4>}, {transform_indices = @transform_7, window_bounds = array<i64: 16, 4>}]} {
    %c0 = arith.constant 0 : index
    %c0_0 = arith.constant 0 : index
    %0 = vector.load %arg1[%c0, %c0_0] : memref<16x16xf32, #tpu.memory_space<vmem>>, vector<16x16xf32>
    %c0_1 = arith.constant 0 : index
    %c0_2 = arith.constant 0 : index
    %1 = vector.load %arg3[%c0_1, %c0_2] : memref<16x128xf32, #tpu.memory_space<vmem>>, vector<16x128xf32>
    %cst = arith.constant dense<0.000000e+00> : vector<16x128xf32>
    %2 = tpu.matmul %0, %1, %cst {dimension_numbers = #tpu.dot_dimension_numbers<[1], [0], [0], [1], [0, 0, 1, 1], [], []>} : vector<16x16xf32>, vector<16x128xf32>, vector<16x128xf32> -> vector<16x128xf32>
    %c0_3 = arith.constant 0 : index
    %c0_4 = arith.constant 0 : index
    %3 = vector.load %arg2[%c0_3, %c0_4] : memref<16x8xf32, #tpu.memory_space<vmem>>, vector<16x8xf32>
    %c0_5 = arith.constant 0 : index
    %c0_6 = arith.constant 0 : index
    %4 = vector.load %arg4[%c0_5, %c0_6] : memref<8x128xf32, #tpu.memory_space<vmem>>, vector<8x128xf32>
    %cst_7 = arith.constant dense<0.000000e+00> : vector<16x128xf32>
    %5 = tpu.matmul %3, %4, %cst_7 {dimension_numbers = #tpu.dot_dimension_numbers<[1], [0], [0], [1], [0, 0, 1, 1], [], []>} : vector<16x8xf32>, vector<8x128xf32>, vector<16x128xf32> -> vector<16x128xf32>
    %6 = arith.addf %2, %5 : vector<16x128xf32>
    %c0_8 = arith.constant 0 : index
    %c0_9 = arith.constant 0 : index
    %7 = vector.load %arg5[%c0_8, %c0_9] : memref<1x128xf32, #tpu.memory_space<vmem>>, vector<1x128xf32>
    %8 = vector.broadcast %7 : vector<1x128xf32> to vector<16x128xf32>
    %9 = arith.addf %6, %8 : vector<16x128xf32>
    %cst_10 = arith.constant 0.000000e+00 : f32
    %10 = vector.broadcast %cst_10 : f32 to vector<16x128xf32>
    %11 = arith.maximumf %9, %10 : vector<16x128xf32>
    %c0_11 = arith.constant 0 : index
    %c0_12 = arith.constant 0 : index
    %12 = vector.load %arg6[%c0_11, %c0_12] : memref<128x4xf32, #tpu.memory_space<vmem>>, vector<128x4xf32>
    %cst_13 = arith.constant dense<0.000000e+00> : vector<16x4xf32>
    %13 = tpu.matmul %11, %12, %cst_13 {dimension_numbers = #tpu.dot_dimension_numbers<[1], [0], [0], [1], [0, 0, 1, 1], [], []>} : vector<16x128xf32>, vector<128x4xf32>, vector<16x4xf32> -> vector<16x4xf32>
    %c0_14 = arith.constant 0 : index
    %c0_15 = arith.constant 0 : index
    %14 = vector.load %arg7[%c0_14, %c0_15] : memref<1x4xf32, #tpu.memory_space<vmem>>, vector<1x4xf32>
    %15 = vector.broadcast %14 : vector<1x4xf32> to vector<16x4xf32>
    %16 = arith.addf %13, %15 : vector<16x4xf32>
    %c0_16 = arith.constant 0 : index
    %c0_17 = arith.constant 0 : index
    %17 = vector.load %arg8[%c0_16, %c0_17] : memref<16x4xf32, #tpu.memory_space<vmem>>, vector<16x4xf32>
    tpu.vector_store %arg8[%c0_16, %c0_17], %16 {strides = array<i32>} : memref<16x4xf32, #tpu.memory_space<vmem>>, vector<16x4xf32>,
    return
  }
  func.func @transform_0(%arg0: i32) -> (i32, i32) {
    %c0_i32 = arith.constant 0 : i32
    %c0_i32_0 = arith.constant 0 : i32
    return %arg0, %c0_i32 : i32, i32
  }
  func.func @transform_1(%arg0: i32) -> (i32, i32) {
    %c0_i32 = arith.constant 0 : i32
    %c0_i32_0 = arith.constant 0 : i32
    return %arg0, %c0_i32 : i32, i32
  }
  func.func @transform_2(%arg0: i32) -> (i32, i32) {
    %c0_i32 = arith.constant 0 : i32
    %c0_i32_0 = arith.constant 0 : i32
    %c0_i32_1 = arith.constant 0 : i32
    return %c0_i32, %c0_i32_0 : i32, i32
  }
  func.func @transform_3(%arg0: i32) -> (i32, i32) {
    %c0_i32 = arith.constant 0 : i32
    %c0_i32_0 = arith.constant 0 : i32
    %c0_i32_1 = arith.constant 0 : i32
    return %c0_i32, %c0_i32_0 : i32, i32
  }
  func.func @transform_4(%arg0: i32) -> (i32, i32) {
    %c0_i32 = arith.constant 0 : i32
    %c0_i32_0 = arith.constant 0 : i32
    %c0_i32_1 = arith.constant 0 : i32
    return %c0_i32, %c0_i32_0 : i32, i32
  }
  func.func @transform_5(%arg0: i32) -> (i32, i32) {
    %c0_i32 = arith.constant 0 : i32
    %c0_i32_0 = arith.constant 0 : i32
    %c0_i32_1 = arith.constant 0 : i32
    return %c0_i32, %c0_i32_0 : i32, i32
  }
  func.func @transform_6(%arg0: i32) -> (i32, i32) {
    %c0_i32 = arith.constant 0 : i32
    %c0_i32_0 = arith.constant 0 : i32
    %c0_i32_1 = arith.constant 0 : i32
    return %c0_i32, %c0_i32_0 : i32, i32
  }
  func.func @transform_7(%arg0: i32) -> (i32, i32) {
    %c0_i32 = arith.constant 0 : i32
    %c0_i32_0 = arith.constant 0 : i32
    return %arg0, %c0_i32 : i32, i32
  }
}

</mosaic_0001>

<bundles_post_ra>
// kernel: _qactor_forward.1
= control target key start
LH: loop header
LB: loop body
LE: loop exit
PB: predicated region body
PF: predicated region fallthrough
CT: control target
= control target key end

     0   :  { %vm33_vm0 = vcmask 64512   ;;  %vm115_vm1 = vcmask 130048   ;;  %vm306_vm2 = vcmask 31744   ;;  %s512_s3 = inlined_call_operand.vmem [shape: f32[8,128], index: 3, kind: input, shape index: {}]   ;;  %s513_s1 = inlined_call_operand.vmem [shape: f32[16,8], index: 1, kind: input, shape index: {}]   ;;  %s514_s2 = inlined_call_operand.vmem [shape: f32[16,128], index: 2, kind: input, shape index: {}]   ;;  %s515_s0 = inlined_call_operand.vmem [shape: f32[16,16], index: 0, kind: input, shape index: {}]   ;;  %s516_s5 = inlined_call_operand.vmem [shape: f32[128,4], index: 5, kind: input, shape index: {}]   ;;  %s517_s4 = inlined_call_operand.vmem [shape: f32[1,128], index: 4, kind: input, shape index: {}]   ;;  %s518_s6 = inlined_call_operand.vmem [shape: f32[1,4], index: 6, kind: input, shape index: {}]   ;;  %s519_s7 = inlined_call_operand.vmem [shape: f32[16,4], index: 7, kind: output, shape index: {}]  }
   0x1   :  { %v32_v0 = vld [vmem:[%s512_s3] sm:$0xff]  ;;  %v31_v2 = vld [vmem:[%s513_s1 + $0x8] sm:$0xff]  ;;  %v223_v6 = vld [vmem:[%s516_s5 + $0x78] sm:$0xff] }
   0x2   :  { %v30_v1 = vld [vmem:[%s513_s1] sm:$0xff]  ;;  %344 = vmatprep.subr.mxu1 %v32_v0  ;;  %v29_v3 = vld [vmem:[%s514_s2 + $0x8] sm:$0xff]  ;;  %v222_v8 = vld [vmem:[%s516_s5 + $0x70] sm:$0xff]  ;;  %356 = vmatprep.subr.mxu0 %v223_v6 }
   0x3   :  { %346 = vmatprep.mubr.msk.f32.mxu1 %vm33_vm0, %v30_v1  ;;  %v26_v4 = vld [vmem:[%s515_s0] sm:$0xff]  ;;  %345 = vmatpush3.msra.mxu1 %v32_v0  ;;  %v27_v7 = vld [vmem:[%s515_s0 + $0x8] sm:$0xff]  ;;  %v219_v11 = vld [vmem:[%s516_s5 + $0x58] sm:$0xff] }
   0x4   :  { %v28_v5 = vld [vmem:[%s514_s2] sm:$0xff]  ;;  %347 = vmatmul.mubr.msk.f32.vlgmr.msra.gmra.mxu1 %vm33_vm0, %v31_v2  ;;  %349 = vmatprep.subr.mxu1 %v29_v3  ;;  %v221_v9 = vld [vmem:[%s516_s5 + $0x68] sm:$0xff]  ;;  %v218_v12 = vld [vmem:[%s516_s5 + $0x50] sm:$0xff] }
   0x5   :  { %350 = vmatpush3.msra.mxu1 %v29_v3  ;;  %353 = vmatprep.mubr.msk.f32.mxu1 %vm115_vm1, %v26_v4  ;;  %v220_v10 = vld [vmem:[%s516_s5 + $0x60] sm:$0xff]  ;;  %v217_v13 = vld [vmem:[%s516_s5 + $0x48] sm:$0xff]  ;;  %v215_v15 = vld [vmem:[%s516_s5 + $0x38] sm:$0xff] }
   0x6   :  { %351 = vmatprep.subr.mxu1 %v28_v5  ;;  %357 = vmatpush3.msra.mxu0 %v223_v6  ;;  %v216_v14 = vld [vmem:[%s516_s5 + $0x40] sm:$0xff]  ;;  %v214_v16 = vld [vmem:[%s516_s5 + $0x30] sm:$0xff]  ;;  %v213_v17 = vld [vmem:[%s516_s5 + $0x28] sm:$0xff] }
   0x7   :  { %352 = vmatpush3.msra.mxu1 %v28_v5  ;;  %358 = vmatprep.subr.mxu0 %v222_v8  ;;  %v212_v18 = vld [vmem:[%s516_s5 + $0x20] sm:$0xff]  ;;  %v211_v19 = vld [vmem:[%s516_s5 + $0x18] sm:$0xff]  ;;  %v210_v20 = vld [vmem:[%s516_s5 + $0x10] sm:$0xff] }
   0x8   :  { %354 = vmatmul.mubr.msk.f32.vlgmr.msra.gmra.mxu1 %vm115_vm1, %v27_v7  ;;  %359 = vmatpush3.msra.mxu0 %v222_v8  ;;  %v209_v21 = vld [vmem:[%s516_s5 + $0x8] sm:$0xff]  ;;  %v208_v22 = vld [vmem:[%s516_s5] sm:$0xff] }
   0x9   :  { %360 = vmatprep.subr.mxu0 %v221_v9  ;;  %v317_v27 = vld [vmem:[%s517_s4] ss:$0 sm:$0xff] }
   0xa   :  { %361 = vmatpush3.msra.mxu0 %v221_v9  ;;  %v318_v34 = vld [vmem:[%s518_s6] ss:$0 sm:$0xff] }
   0xb   :  { %362 = vmatprep.subr.mxu0 %v220_v10 }
   0xc   :  { %363 = vmatpush3.msra.mxu0 %v220_v10 }
   0xd   :  { %364 = vmatprep.subr.mxu0 %v219_v11 }
   0xe   :  { %365 = vmatpush3.msra.mxu0 %v219_v11 }
   0xf   :  { %366 = vmatprep.subr.mxu0 %v218_v12 }
  0x10   :  { %367 = vmatpush3.msra.mxu0 %v218_v12 }
  0x11   :  { %368 = vmatprep.subr.mxu0 %v217_v13 }
  0x12   :  { %369 = vmatpush3.msra.mxu0 %v217_v13 }
  0x13   :  { %370 = vmatprep.subr.mxu0 %v216_v14 }
  0x14   :  { %371 = vmatpush3.msra.mxu0 %v216_v14 }
  0x15   :  { %372 = vmatprep.subr.mxu0 %v215_v15 }
  0x16   :  { %373 = vmatpush3.msra.mxu0 %v215_v15 }
  0x17   :  { %374 = vmatprep.subr.mxu0 %v214_v16 }
  0x18   :  { %375 = vmatpush3.msra.mxu0 %v214_v16 }
  0x19   :  { %376 = vmatprep.subr.mxu0 %v213_v17 }
  0x1a   :  { %377 = vmatpush3.msra.mxu0 %v213_v17 }
  0x1b   :  { %378 = vmatprep.subr.mxu0 %v212_v18 }
  0x1c   :  { %379 = vmatpush3.msra.mxu0 %v212_v18 }
  0x1d   :  { %380 = vmatprep.subr.mxu0 %v211_v19 }
  0x1e   :  { %381 = vmatpush3.msra.mxu0 %v211_v19 }
  0x1f   :  { %382 = vmatprep.subr.mxu0 %v210_v20 }
  0x20   :  { %383 = vmatpush3.msra.mxu0 %v210_v20 }
  0x21   :  { %384 = vmatprep.subr.mxu0 %v209_v21 }
  0x22   :  { %385 = vmatpush3.msra.mxu0 %v209_v21 }
  0x23   :  { %386 = vmatprep.subr.mxu0 %v208_v22 }
  0x24   :  { %387 = vmatpush3.msra.mxu0 %v208_v22 }
  0xc4   :  { %v348_v23 = vpop.f32.mrf.mxu1 }
  0xc6   :  { %v106_v24 = vpop.f32.mrf.mxu1 }
  0xc8   :  { %v355_v25 = vpop.f32.mrf.mxu1 }
  0xc9   :  { %v194_v26 = vadd.f32 %v355_v25, %v348_v23 }
  0xca   :  { %v188_v28 = vpop.f32.mrf.mxu1 }
  0xcb   :  { %v189_v29 = vadd.f32 %v188_v28, %v106_v24  ;;  %v205_v30 = vadd.f32 %v317_v27, %v194_v26 }
  0xcd   :  { %v204_v31 = vadd.f32 %v317_v27, %v189_v29  ;;  %v207_v33 = vmax.f32 %v205_v30, 0.0 }
  0xcf   :  { %v206_v32 = vmax.f32 %v204_v31, 0.0 }
  0xd1   :  { %388 = vmatprep.mubr.f32.mxu0 %v206_v32 }
  0xd2   :  { %389 = vmatmul.mubr.f32.vlgmr.msra.gmra.mxu0 %v207_v33 }
 0x192   :  { %v390_v35 = vpop.f32.mrf.mxu0 }
 0x193   :  { %v303_v36 = vadd.f32 %v390_v35, %v318_v34 }
 0x194   :  { %v297_v37 = vpop.f32.mrf.mxu0 }
 0x195   :  { %308 = vst.msk [vmem:[%s519_s7 + $0x8] sm:$0xff] %vm306_vm2, %v303_v36  ;;  %v298_v38 = vadd.f32 %v318_v34, %v297_v37 }
 0x197   :  { %307 = vst.msk [vmem:[%s519_s7] sm:$0xff] %vm306_vm2, %v298_v38 }

</bundles_post_ra>
